<compile_context>
chip_gen: v6e
topology: v6e:2x2x1
jax: 0.10.0
libtpu: 0.0.40
codegen_flags: <defaults>
</compile_context>

<pallas_src>
import functools

import jax
import jax.numpy as jnp
from jax import lax
from jax.experimental import pallas as pl
from jax.experimental.pallas import tpu as pltpu


# ----------------------------- host-side helpers -----------------------------

def _round_up(n, m):
    return ((n + m - 1) // m) * m


def _prep_gate_weight(w, hp):
    """PyTorch (4H, X) gate-major rows (i,f,g,o) -> (X, 4Hp) cols (i,f,o,g),
    zero-padded per gate block so each gate occupies exactly Hp lanes."""
    h = w.shape[0] // 4
    gi, gf, gg, go = w[:h], w[h:2 * h], w[2 * h:3 * h], w[3 * h:]

    def pad(m):
        return jnp.pad(m, ((0, hp - h), (0, 0)))

    return jnp.concatenate([pad(gi), pad(gf), pad(go), pad(gg)], axis=0).T


def _spec(shape, index_map, n_buf=None):
    """BlockSpec; constant-index weights get a single pipeline buffer."""
    if n_buf is not None:
        try:
            return pl.BlockSpec(shape, index_map, pipeline_mode=pl.Buffered(n_buf))
        except Exception:
            pass
    return pl.BlockSpec(shape, index_map)


# ----------------------------- Kernel A: projection -----------------------------

def proj_kernel(x_ref, w8_ref, b8_ref, gx_ref):
    # x_ref: (TM, E), w8_ref: (E, 8Hp), b8_ref: (1, 8Hp), gx_ref: (TM, 8Hp)
    # TODO(synk): cast x/w8 to bf16 on v6e/v7x for extra MXU headroom (kept f32 so
    # the f32 gx path holds the 1e-5 reference tolerance).
    g = jnp.dot(x_ref[...], w8_ref[...], preferred_element_type=jnp.float32) + b8_ref[...]
    gx_ref[...] = g.astype(gx_ref.dtype)


# ----------------------------- Kernel B: recurrence -----------------------------

def lstm_recur_kernel(gxf_ref, gxb_ref, wrec_ref, wlin_ref, blin_ref,
                      out_ref, h_sc, c_sc, *, fuse, n_pad, t_real):
    # gxf_ref/gxb_ref: (TTR, BB, 4Hp) precomputed input gates (+bias), (i,f,o,g) order
    # wrec_ref: (1, 2Hp, 8Hp) block-diag (fused) or (2, Hp, 4Hp) (two dots)
    # wlin_ref: (1, 2Hp), blin_ref: (1, 1)
    # h_sc/c_sc: (BB, 2Hp) lane-concatenated [forward | backward] state
    ti = pl.program_id(1)           # time axis MUST be the innermost ("arbitrary")
    nt = pl.num_programs(1)         # grid axis: the carry reset below relies on it.
    TTR, BB, H4 = gxf_ref.shape
    Hp = H4 // 4

    @pl.when(ti == 0)
    def _():
        h_sc[...] = jnp.zeros_like(h_sc)
        c_sc[...] = jnp.zeros_like(c_sc)

    if fuse:
        w_blk = wrec_ref[0]         # (2Hp, 8Hp)
    else:
        w_f = wrec_ref[0]           # (Hp, 4Hp)
        w_b = wrec_ref[1]

    gs0 = ti * TTR                  # global step base for this time chunk

    def act(gates, c_old):
        sg = jax.nn.sigmoid(gates[:, :3 * Hp])            # i, f, o  (vreg-aligned)
        g = jnp.tanh(gates[:, 3 * Hp:])                    # g
        c_new = sg[:, Hp:2 * Hp] * c_old + sg[:, :Hp] * g
        h_new = sg[:, 2 * Hp:3 * Hp] * jnp.tanh(c_new)
        return h_new, c_new

    def step(s, carry):
        h2 = h_sc[...]
        c2 = c_sc[...]
        hf_old, hb_old = h2[:, :Hp], h2[:, Hp:]
        cf_old, cb_old = c2[:, :Hp], c2[:, Hp:]

        if fuse:
            rec = jnp.dot(h2, w_blk, preferred_element_type=jnp.float32)   # (BB, 8Hp)
            rec_f, rec_b = rec[:, :4 * Hp], rec[:, 4 * Hp:]
        else:
            rec_f = jnp.dot(hf_old, w_f, preferred_element_type=jnp.float32)
            rec_b = jnp.dot(hb_old, w_b, preferred_element_type=jnp.float32)

        gates_f = gxf_ref[s].astype(jnp.float32) + rec_f
        gates_b = gxb_ref[TTR - 1 - s].astype(jnp.float32) + rec_b

        h_f, c_f = act(gates_f, cf_old)
        h_b, c_b = act(gates_b, cb_old)

        if n_pad:   # static: only present when the time axis was padded
            gs = gs0 + s
            keep_f = gs < t_real          # padded steps are at the end of time
            keep_b = gs >= n_pad          # reversed stream hits them first
            h_f = jnp.where(keep_f, h_f, hf_old)
            c_f = jnp.where(keep_f, c_f, cf_old)
            h_b = jnp.where(keep_b, h_b, hb_old)
            c_b = jnp.where(keep_b, c_b, cb_old)

        h_sc[:, :Hp] = h_f
        h_sc[:, Hp:] = h_b
        c_sc[:, :Hp] = c_f
        c_sc[:, Hp:] = c_b
        return carry

    lax.fori_loop(0, TTR, step, 0, unroll=TTR)

    @pl.when(ti == nt - 1)
    def _():
        # Linear(2H -> 1) as a lane reduction (N=1 is the worst MXU shape).
        h2 = h_sc[...]
        out_ref[...] = (jnp.sum(h2 * wlin_ref[...], axis=-1, keepdims=True)
                        + blin_ref[...])


# ----------------------------- wrapper -----------------------------

def lstm_forward(x, params, *, gx_dtype=jnp.float32, fuse_rec=None):
    """x: (B, T, E) float32, batch-first (matches the PyTorch module)."""
    B, T, E = x.shape
    H = params["w_hh_f"].shape[1]
    Hp = _round_up(H, 128)                      # vreg-aligned gate slices
    fuse = (Hp <= 128) if fuse_rec is None else bool(fuse_rec)
    gx_itemsize = jnp.dtype(gx_dtype).itemsize

    # --- per-generation VMEM budget (v7x: 64 MiB, v5e/v6e: 128 MiB) ---
    try:
        vmem_cap = int(pltpu.get_tpu_info().vmem_capacity_bytes)
    except Exception:
        vmem_cap = 64 * 1024 * 1024             # conservative (v7x) fallback
    budget = int(vmem_cap * 0.6)
    vmem_limit = int(vmem_cap * 0.8)

    x = x.astype(jnp.float32)

    # --- robust tile selection: pad instead of degenerating to tiny divisors ---
    Bp0 = _round_up(B, 8)
    nb = -(-Bp0 // 256)                                       # target batch blocks
    BB = min(Bp0, _round_up(-(-Bp0 // nb), 8))                # rows per block (mult of 8)
    TTR = T if T <= 16 else 16                                # steps per time chunk

    def recur_vmem(ttr, bb):
        gx = 2 * 2 * ttr * bb * 4 * Hp * gx_itemsize          # 2 dirs x 2 buffers
        wrec_elems = (2 * Hp) * (8 * Hp) if fuse else 2 * (Hp * 4 * Hp)
        scr = 2 * bb * 2 * Hp * 4
        return gx + wrec_elems * 4 + scr + 8 * Hp * 4 + 1024

    while recur_vmem(TTR, BB) > budget:
        if TTR > 2:
            TTR = max(2, TTR // 2)
        elif BB > 8:
            BB = max(8, ((BB // 2) // 8) * 8)
        else:
            break

    Bc = -(-Bp0 // BB)
    Bp = Bc * BB
    Tp = _round_up(T, TTR)
    n_pad = Tp - T
    Tc = Tp // TTR

    if Bp != B or n_pad:
        x = jnp.pad(x, ((0, Bp - B), (0, n_pad), (0, 0)))

    # --- weight prep: gate-permuted (i,f,o,g), per-gate zero-padded to Hp lanes ---
    wih_f = _prep_gate_weight(params["w_ih_f"], Hp)                       # (E, 4Hp)
    wih_b = _prep_gate_weight(params["w_ih_b"], Hp)
    whh_f = jnp.pad(_prep_gate_weight(params["w_hh_f"], Hp), ((0, Hp - H), (0, 0)))
    whh_b = jnp.pad(_prep_gate_weight(params["w_hh_b"], Hp), ((0, Hp - H), (0, 0)))
    b_f = _prep_gate_weight((params["b_ih_f"] + params["b_hh_f"])[:, None], Hp)
    b_b = _prep_gate_weight((params["b_ih_b"] + params["b_hh_b"])[:, None], Hp)
    w8 = jnp.concatenate([wih_f, wih_b], axis=1)                          # (E, 8Hp)
    b8 = jnp.concatenate([b_f, b_b], axis=1)                              # (1, 8Hp)

    if fuse:
        w_blk = jnp.zeros((2 * Hp, 8 * Hp), jnp.float32)
        w_blk = w_blk.at[:Hp, :4 * Hp].set(whh_f)
        w_blk = w_blk.at[Hp:, 4 * Hp:].set(whh_b)
        wrec = w_blk[None]                                                # (1, 2Hp, 8Hp)
    else:
        wrec = jnp.stack([whh_f, whh_b])                                  # (2, Hp, 4Hp)

    wl = params["w_lin"].reshape(-1)                                      # (2H,)
    wlin = jnp.concatenate([jnp.pad(wl[:H], (0, Hp - H)),
                            jnp.pad(wl[H:], (0, Hp - H))])[None, :]       # (1, 2Hp)
    blin = params["b_lin"].reshape(1, 1)

    # --- Kernel A: hoisted input projection, streamed over row tiles ---
    rows = Tp * Bp
    x2d = jnp.transpose(x, (1, 0, 2)).reshape(rows, E)                    # row = t*Bp + b

    TM = min(512, rows)
    def proj_vmem(tm):
        return (2 * tm * E * 4 + 2 * tm * 8 * Hp * gx_itemsize
                + E * 8 * Hp * 4 + 8 * Hp * 4)
    while proj_vmem(TM) > budget and TM > 8:
        TM = max(8, ((TM // 2) // 8) * 8)
    rows_p = _round_up(rows, TM)
    if rows_p != rows:
        x2d = jnp.pad(x2d, ((0, rows_p - rows), (0, 0)))

    gx = pl.pallas_call(
        proj_kernel,
        out_shape=jax.ShapeDtypeStruct((rows_p, 8 * Hp), gx_dtype),
        grid=(rows_p // TM,),
        in_specs=[pl.BlockSpec((TM, E), lambda i: (i, 0)),
                  _spec((E, 8 * Hp), lambda i: (0, 0), n_buf=1),
                  _spec((1, 8 * Hp), lambda i: (0, 0), n_buf=1)],
        out_specs=pl.BlockSpec((TM, 8 * Hp), lambda i: (i, 0)),
        compiler_params=pltpu.CompilerParams(
            dimension_semantics=("parallel",),
            vmem_limit_bytes=vmem_limit),
    )(x2d, w8, b8)

    if rows_p != rows:
        gx = gx[:rows]
    gx = gx.reshape(Tp, Bp, 8 * Hp)

    # --- Kernel B: recurrence.  Grid = (batch blocks [parallel], time chunks [arbitrary]).
    # NOTE: the h/c carry reset at ti==0 requires the time axis to stay the innermost,
    # sequentially-iterated ("arbitrary") grid axis — do not reorder the grid.
    kernel = functools.partial(lstm_recur_kernel, fuse=fuse, n_pad=n_pad, t_real=T)
    out = pl.pallas_call(
        kernel,
        out_shape=jax.ShapeDtypeStruct((Bp, 1), jnp.float32),
        grid=(Bc, Tc),
        in_specs=[pl.BlockSpec((TTR, BB, 4 * Hp), lambda j, i: (i, j, 0)),
                  pl.BlockSpec((TTR, BB, 4 * Hp), lambda j, i: (Tc - 1 - i, j, 1)),
                  _spec(wrec.shape, lambda j, i: (0, 0, 0), n_buf=1),
                  _spec((1, 2 * Hp), lambda j, i: (0, 0), n_buf=1),
                  _spec((1, 1), lambda j, i: (0, 0), n_buf=1)],
        out_specs=pl.BlockSpec((BB, 1), lambda j, i: (j, 0)),
        scratch_shapes=[pltpu.VMEM((BB, 2 * Hp), jnp.float32),
                        pltpu.VMEM((BB, 2 * Hp), jnp.float32)],
        compiler_params=pltpu.CompilerParams(
            dimension_semantics=("parallel", "arbitrary"),
            vmem_limit_bytes=vmem_limit),
    )(gx, gx, wrec, wlin, blin)

    return out[:B]


# ----------------------------- params & reference -----------------------------

def init_params(key, embedding_dim, hidden_dim):
    """PyTorch-layout params, U(-1/sqrt(H), 1/sqrt(H)), gate order (i,f,g,o)."""
    E, H = embedding_dim, hidden_dim
    ks = jax.random.split(key, 10)
    bound = 1.0 / float(H) ** 0.5

    def u(k, shape):
        return jax.random.uniform(k, shape, jnp.float32, -bound, bound)

    # TODO(synk): nn.LSTM dropout is a no-op for a single-layer forward pass, so it
    # is intentionally not modeled.
    return dict(
        w_ih_f=u(ks[0], (4 * H, E)), w_hh_f=u(ks[1], (4 * H, H)),
        b_ih_f=u(ks[2], (4 * H,)),  b_hh_f=u(ks[3], (4 * H,)),
        w_ih_b=u(ks[4], (4 * H, E)), w_hh_b=u(ks[5], (4 * H, H)),
        b_ih_b=u(ks[6], (4 * H,)),  b_hh_b=u(ks[7], (4 * H,)),
        w_lin=u(ks[8], (1, 2 * H)), b_lin=u(ks[9], (1,)),
    )


def lstm_ref(x, params):
    """Pure-JAX reference matching the PyTorch module's forward pass."""
    B, T, E = x.shape
    H = params["w_hh_f"].shape[1]

    def run_dir(xs, w_ih, w_hh, b):
        def step(carry, x_t):
            h, c = carry
            gates = x_t @ w_ih.T + h @ w_hh.T + b
            i = jax.nn.sigmoid(gates[:, :H])
            f = jax.nn.sigmoid(gates[:, H:2 * H])
            g = jnp.tanh(gates[:, 2 * H:3 * H])
            o = jax.nn.sigmoid(gates[:, 3 * H:])
            c = f * c + i * g
            h = o * jnp.tanh(c)
            return (h, c), h

        init = (jnp.zeros((B, H), jnp.float32), jnp.zeros((B, H), jnp.float32))
        (h, _), _ = lax.scan(step, init, xs)
        return h

    xs = jnp.transpose(x, (1, 0, 2))
    h_f = run_dir(xs, params["w_ih_f"], params["w_hh_f"],
                  params["b_ih_f"] + params["b_hh_f"])
    h_b = run_dir(xs[::-1], params["w_ih_b"], params["w_hh_b"],
                  params["b_ih_b"] + params["b_hh_b"])
    hcat = jnp.concatenate([h_f, h_b], axis=1)
    return hcat @ params["w_lin"].T + params["b_lin"]


if __name__ == "__main__":
    B, T, E, H = 2, 8, 16, 32

    key = jax.random.PRNGKey(0)
    k_x, k_p = jax.random.split(key)
    x = jax.random.normal(k_x, (B, T, E), jnp.float32)   # text: (batch, seq, emb)
    params = init_params(k_p, E, H)

    out = jax.block_until_ready(lstm_forward(x, params))
    ref = jax.block_until_ready(lstm_ref(x, params))
    assert out.shape == (B, 1)
    assert jnp.allclose(out, ref, atol=1e-5, rtol=1e-5), (out, ref)

    # bf16 gate-stream variant (halves Kernel A HBM traffic / Kernel B gx VMEM).
    out_bf = jax.block_until_ready(lstm_forward(x, params, gx_dtype=jnp.bfloat16))
    assert jnp.allclose(out_bf, ref, atol=5e-2, rtol=5e-2), (out_bf, ref)

    # Awkward shapes: exercises batch padding, time padding + masking, multi
    # time-chunk carry, and the non-fused two-dot recurrent path.
    B2, T2 = 3, 19
    x2 = jax.random.normal(jax.random.PRNGKey(1), (B2, T2, E), jnp.float32)
    ref2 = jax.block_until_ready(lstm_ref(x2, params))
    out2 = jax.block_until_ready(lstm_forward(x2, params))
    assert jnp.allclose(out2, ref2, atol=1e-4, rtol=1e-4), (out2, ref2)
    out3 = jax.block_until_ready(lstm_forward(x2, params, fuse_rec=False))
    assert jnp.allclose(out3, ref2, atol=1e-4, rtol=1e-4), (out3, ref2)

    print("KERNEL_OK")
</pallas_src>

<mosaic_0001>
module attributes {stable_mosaic.version = 11 : i64} {
  func.func @proj_kernel(%arg0: i32, %arg1: memref<64x16xf32, #tpu.memory_space<vmem>>, %arg2: memref<16x1024xf32, #tpu.memory_space<vmem>>, %arg3: memref<1x1024xf32, #tpu.memory_space<vmem>>, %arg4: memref<64x1024xf32, #tpu.memory_space<vmem>>) attributes {dimension_semantics = [#tpu.dimension_semantics<parallel>], iteration_bounds = array<i64: 1>, scalar_prefetch = 0 : i64, scratch_operands = 0 : i64, tpu.core_type = #tpu.core_type<tc>, window_params = [{transform_indices = @transform_0, window_bounds = array<i64: 64, 16>}, {pipeline_mode = #tpu.pipeline_mode<synchronous>, transform_indices = @transform_1, window_bounds = array<i64: 16, 1024>}, {pipeline_mode = #tpu.pipeline_mode<synchronous>, transform_indices = @transform_2, window_bounds = array<i64: 1, 1024>}, {transform_indices = @transform_3, window_bounds = array<i64: 64, 1024>}]} {
    %c0 = arith.constant 0 : index
    %c0_0 = arith.constant 0 : index
    %0 = vector.load %arg1[%c0, %c0_0] : memref<64x16xf32, #tpu.memory_space<vmem>>, vector<64x16xf32>
    %c0_1 = arith.constant 0 : index
    %c0_2 = arith.constant 0 : index
    %1 = vector.load %arg2[%c0_1, %c0_2] : memref<16x1024xf32, #tpu.memory_space<vmem>>, vector<16x1024xf32>
    %cst = arith.constant dense<0.000000e+00> : vector<64x1024xf32>
    %2 = tpu.matmul %0, %1, %cst {dimension_numbers = #tpu.dot_dimension_numbers<[1], [0], [0], [1], [0, 0, 1, 1], [], []>} : vector<64x16xf32>, vector<16x1024xf32>, vector<64x1024xf32> -> vector<64x1024xf32>
    %c0_3 = arith.constant 0 : index
    %c0_4 = arith.constant 0 : index
    %3 = vector.load %arg3[%c0_3, %c0_4] : memref<1x1024xf32, #tpu.memory_space<vmem>>, vector<1x1024xf32>
    %4 = vector.broadcast %3 : vector<1x1024xf32> to vector<64x1024xf32>
    %5 = arith.addf %2, %4 : vector<64x1024xf32>
    %c0_5 = arith.constant 0 : index
    %c0_6 = arith.constant 0 : index
    %6 = vector.load %arg4[%c0_5, %c0_6] : memref<64x1024xf32, #tpu.memory_space<vmem>>, vector<64x1024xf32>
    tpu.vector_store %arg4[%c0_5, %c0_6], %5 {strides = array<i32>} : memref<64x1024xf32, #tpu.memory_space<vmem>>, vector<64x1024xf32>,
    return
  }
  func.func @transform_0(%arg0: i32) -> (i32, i32) {
    %c0_i32 = arith.constant 0 : i32
    %c0_i32_0 = arith.constant 0 : i32
    return %arg0, %c0_i32 : i32, i32
  }
  func.func @transform_1(%arg0: i32) -> (i32, i32) {
    %c0_i32 = arith.constant 0 : i32
    %c0_i32_0 = arith.constant 0 : i32
    %c0_i32_1 = arith.constant 0 : i32
    return %c0_i32, %c0_i32_0 : i32, i32
  }
  func.func @transform_2(%arg0: i32) -> (i32, i32) {
    %c0_i32 = arith.constant 0 : i32
    %c0_i32_0 = arith.constant 0 : i32
    %c0_i32_1 = arith.constant 0 : i32
    return %c0_i32, %c0_i32_0 : i32, i32
  }
  func.func @transform_3(%arg0: i32) -> (i32, i32) {
    %c0_i32 = arith.constant 0 : i32
    %c0_i32_0 = arith.constant 0 : i32
    return %arg0, %c0_i32 : i32, i32
  }
}

</mosaic_0001>

<bundles_post_ra>
// kernel: tpu_custom_call.1
= control target key start
LH: loop header
LB: loop body
LE: loop exit
PB: predicated region body
PF: predicated region fallthrough
CT: control target
= control target key end

     0   :  { %8 = vsyncpa [#allocation3], 0  ;;  %s962_s0 = inlined_call_operand.vmem [shape: f32[64,16], index: 0, kind: input, shape index: {}]   ;;  %s963_s1 = inlined_call_operand.hbm [shape: f32[16,1024], index: 1, kind: input, shape index: {}]   ;;  %s964_s2 = inlined_call_operand.vmem [shape: f32[1,1024], index: 2, kind: input, shape index: {}]   ;;  %s965_s3 = inlined_call_operand.hbm [shape: f32[64,1024], index: 3, kind: output, shape index: {}]  }
   0x1   :  { %9 = vsyncpa [#allocation4], 0  ;;  %s734_s12 = smov [#allocation2]  }
   0x2   :  { %s17_s13 = sshll.u32 %s734_s12, 4  ;;  %s18_s13 = int_to_ptr.vmem [resolvable:$true] %s17_s13 }
   0x3   :  { %s698_s14 = scalar_lea.vmem %s18_s13, 2048  ;;  %p703_p1 = scmp.lt.s32.totalorder %s18_s13, %s18_s13 }
   0x4   :  { %p699_p0 = scmp.ne.s32.totalorder %s18_s13, %s698_s14  ;;  %p704_p2 = scmp.lt.s32.totalorder %s698_s14, %s698_s14 }
   0x6   :  { %p705_p3 = por %p704_p2, %p703_p1 }
   0x8   :  { %p706_p4 = pnand %p705_p3, %p699_p0 }
   0xa   :  { %709 = shalt.err (!%p706_p4)
}
   0xb   :  { %s735_s15 = smov 1024   ;;  %s736_s16 = smov 64  }
   0xc   :  { %23 = dma.hbm_to_vmem [thread:$0]  %s963_s1, 2048, %s18_s13, [#allocation3], %s735_s15, %s735_s15, %s736_s16  }
   0xd   :  { %730 = dma.done.wait [#allocation3], 2048  }
   0xe   :  { %731 = vsyncadd [#allocation3], 4294965248  ;;  %v737_v0 = vmov 0.0   ;;  %v46_v1 = vld [vmem:[#allocation2 + $0x48] sm:$0xff]  ;;  %v48_v2 = vld [vmem:[#allocation2 + $0x58] sm:$0xff]  ;;  %vm95_vm0 = vcmask 130048   ;;  %v55_v25 = vlaneseq }
   0xf   :  { %184 = vmatprep.mubr.f32.mxu0 %v737_v0  ;;  %297 = vmatprep.mubr.f32.mxu1 %v737_v0  ;;  %v45_v3 = vld [vmem:[#allocation2 + $0x40] sm:$0xff]  ;;  %v47_v4 = vld [vmem:[#allocation2 + $0x50] sm:$0xff]  ;;  %v38_v5 = vld [vmem:[#allocation2 + $0x8] sm:$0xff] }
  0x10   :  { %148 = vmatprep.subr.mxu0 %v46_v1  ;;  %261 = vmatprep.subr.mxu1 %v48_v2  ;;  %v40_v6 = vld [vmem:[#allocation2 + $0x18] sm:$0xff]  ;;  %v37_v7 = vld [vmem:[#allocation2] sm:$0xff]  ;;  %v39_v8 = vld [vmem:[#allocation2 + $0x10] sm:$0xff]  ;;  %v853_v26 = vshrl.u32 %v55_v25, 7 }
  0x11   :  { %149 = vmatpush1.msra.mxu0 %v45_v3  ;;  %262 = vmatpush1.msra.mxu1 %v47_v4  ;;  %v29_v9 = vld [vmem:[%s962_s0] sm:$0xff]  ;;  %v50_v10 = vld [vmem:[#allocation2 + $0x68] sm:$0xff]  ;;  %v52_v11 = vld [vmem:[#allocation2 + $0x78] sm:$0xff] }
  0x12   :  { %150 = vmatprep.subr.mxu0 %v38_v5  ;;  %263 = vmatprep.subr.mxu1 %v40_v6  ;;  %v49_v12 = vld [vmem:[#allocation2 + $0x60] sm:$0xff]  ;;  %v51_v13 = vld [vmem:[#allocation2 + $0x70] sm:$0xff]  ;;  %v30_v14 = vld [vmem:[%s962_s0 + $0x8] sm:$0xff]  ;;  %v57_v27 = vsub.s32 0, %v853_v26  ;;  %v65_v28 = vsub.s32 2, %v853_v26  ;;  %v61_v30 = vsub.s32 1, %v853_v26 }
  0x13   :  { %151 = vmatpush1.msra.mxu0 %v37_v7  ;;  %264 = vmatpush1.msra.mxu1 %v39_v8  ;;  %v42_v15 = vld [vmem:[#allocation2 + $0x28] sm:$0xff]  ;;  %v44_v16 = vld [vmem:[#allocation2 + $0x38] sm:$0xff]  ;;  %v41_v17 = vld [vmem:[#allocation2 + $0x20] sm:$0xff]  ;;  %v69_v31 = vsub.s32 3, %v853_v26  ;;  %v81_v25 = vsub.s32 6, %v853_v26 }
  0x14   :  { %653 = vmatmul.mubr.msk.f32.vlgmr.msra.gmra.mxu0 %vm95_vm0, %v29_v9  ;;  %661 = vmatmul.mubr.msk.f32.vlgmr.msra.gmra.mxu1 %vm95_vm0, %v29_v9  ;;  %v43_v18 = vld [vmem:[#allocation2 + $0x30] sm:$0xff]  ;;  %v32_v20 = vld [vmem:[%s962_s0 + $0x18] sm:$0xff]  ;;  %v33_v21 = vld [vmem:[%s962_s0 + $0x20] sm:$0xff] }
  0x15   :  { %374 = vmatprep.subr.mxu0 %v50_v10  ;;  %487 = vmatprep.subr.mxu1 %v52_v11  ;;  %v31_v19 = vld [vmem:[%s962_s0 + $0x10] sm:$0xff]  ;;  %v34_v22 = vld [vmem:[%s962_s0 + $0x28] sm:$0xff]  ;;  %v36_v24 = vld [vmem:[%s962_s0 + $0x38] sm:$0xff] }
  0x16   :  { %375 = vmatpush1.msra.mxu0 %v49_v12  ;;  %488 = vmatpush1.msra.mxu1 %v51_v13  ;;  %v35_v23 = vld [vmem:[%s962_s0 + $0x30] sm:$0xff]  ;;  %v860_v29 = vld [vmem:[%s964_s2] sm:$0xff]  ;;  %s738_s2 = smov [#allocation5]  }
  0x17   :  { %190 = vmatprep.mubr.f32.mxu0 %v737_v0  ;;  %303 = vmatprep.mubr.f32.mxu1 %v737_v0  ;;  %v865_v32 = vrot.slane %v860_v29, %v57_v27  ;;  %v868_v33 = vrot.slane %v860_v29, %v65_v28  ;;  %v871_v34 = vrot.slane %v860_v29, %v61_v30  ;;  %s641_s8 = sshll.u32 %s738_s2, 4  ;;  %s642_s8 = int_to_ptr.vmem [resolvable:$true] %s641_s8 }
  0x18   :  { %654 = vmatmul.mubr.msk.f32.gmra.mxu0 %vm95_vm0, %v30_v14  ;;  %662 = vmatmul.mubr.msk.f32.gmra.mxu1 %vm95_vm0, %v30_v14  ;;  %v874_v35 = vrot.slane %v860_v29, %v69_v31  ;;  %s710_s9 = scalar_lea.vmem %s642_s8, 8192  ;;  %p715_p6 = scmp.lt.s32.totalorder %s642_s8, %s642_s8 }
  0x19   :  { %196 = vmatprep.mubr.f32.mxu0 %v737_v0  ;;  %309 = vmatprep.mubr.f32.mxu1 %v737_v0  ;;  %p711_p5 = scmp.ne.s32.totalorder %s642_s8, %s710_s9  ;;  %p716_p7 = scmp.lt.s32.totalorder %s710_s9, %s710_s9 }
  0x1a   :  { %376 = vmatprep.subr.mxu0 %v42_v15  ;;  %489 = vmatprep.subr.mxu1 %v44_v16 }
  0x1b   :  { %377 = vmatpush1.msra.mxu0 %v41_v17  ;;  %490 = vmatpush1.msra.mxu1 %v43_v18  ;;  %p717_p8 = por %p716_p7, %p715_p6 }
  0x1c   :  { %655 = vmatmul.mubr.msk.f32.gmra.mxu0 %vm95_vm0, %v31_v19  ;;  %663 = vmatmul.mubr.msk.f32.gmra.mxu1 %vm95_vm0, %v31_v19 }
  0x1d   :  { %202 = vmatprep.mubr.f32.mxu0 %v737_v0  ;;  %315 = vmatprep.mubr.f32.mxu1 %v737_v0  ;;  %p718_p9 = pnand %p717_p8, %p711_p5 }
  0x20   :  { %656 = vmatmul.mubr.msk.f32.gmra.mxu0 %vm95_vm0, %v32_v20  ;;  %664 = vmatmul.mubr.msk.f32.gmra.mxu1 %vm95_vm0, %v32_v20 }
  0x21   :  { %208 = vmatprep.mubr.f32.mxu0 %v737_v0  ;;  %321 = vmatprep.mubr.f32.mxu1 %v737_v0 }
  0x24   :  { %657 = vmatmul.mubr.msk.f32.gmra.mxu0 %vm95_vm0, %v33_v21  ;;  %665 = vmatmul.mubr.msk.f32.gmra.mxu1 %vm95_vm0, %v33_v21 }
  0x25   :  { %214 = vmatprep.mubr.f32.mxu0 %v737_v0  ;;  %327 = vmatprep.mubr.f32.mxu1 %v737_v0 }
  0x28   :  { %658 = vmatmul.mubr.msk.f32.gmra.mxu0 %vm95_vm0, %v34_v22  ;;  %666 = vmatmul.mubr.msk.f32.gmra.mxu1 %vm95_vm0, %v34_v22 }
  0x29   :  { %220 = vmatprep.mubr.f32.mxu0 %v737_v0  ;;  %333 = vmatprep.mubr.f32.mxu1 %v737_v0 }
  0x2c   :  { %659 = vmatmul.mubr.msk.f32.gmra.mxu0 %vm95_vm0, %v35_v23  ;;  %667 = vmatmul.mubr.msk.f32.gmra.mxu1 %vm95_vm0, %v35_v23 }
  0x2d   :  { %226 = vmatprep.mubr.f32.mxu0 %v737_v0  ;;  %339 = vmatprep.mubr.f32.mxu1 %v737_v0 }
  0x30   :  { %660 = vmatmul.mubr.msk.f32.gmra.mxu0 %vm95_vm0, %v36_v24  ;;  %668 = vmatmul.mubr.msk.f32.gmra.mxu1 %vm95_vm0, %v36_v24 }
  0x31   :  { %410 = vmatprep.mubr.f32.mxu0 %v737_v0  ;;  %523 = vmatprep.mubr.f32.mxu1 %v737_v0 }
  0x34   :  { %669 = vmatmul.mubr.msk.f32.vlgmr.msra.gmra.mxu0 %vm95_vm0, %v29_v9  ;;  %677 = vmatmul.mubr.msk.f32.vlgmr.msra.gmra.mxu1 %vm95_vm0, %v29_v9 }
  0x35   :  { %416 = vmatprep.mubr.f32.mxu0 %v737_v0  ;;  %529 = vmatprep.mubr.f32.mxu1 %v737_v0 }
  0x38   :  { %670 = vmatmul.mubr.msk.f32.gmra.mxu0 %vm95_vm0, %v30_v14  ;;  %678 = vmatmul.mubr.msk.f32.gmra.mxu1 %vm95_vm0, %v30_v14 }
  0x39   :  { %422 = vmatprep.mubr.f32.mxu0 %v737_v0  ;;  %535 = vmatprep.mubr.f32.mxu1 %v737_v0 }
  0x3c   :  { %671 = vmatmul.mubr.msk.f32.gmra.mxu0 %vm95_vm0, %v31_v19  ;;  %679 = vmatmul.mubr.msk.f32.gmra.mxu1 %vm95_vm0, %v31_v19 }
  0x3d   :  { %428 = vmatprep.mubr.f32.mxu0 %v737_v0  ;;  %541 = vmatprep.mubr.f32.mxu1 %v737_v0 }
  0x40   :  { %672 = vmatmul.mubr.msk.f32.gmra.mxu0 %vm95_vm0, %v32_v20  ;;  %680 = vmatmul.mubr.msk.f32.gmra.mxu1 %vm95_vm0, %v32_v20 }
  0x41   :  { %434 = vmatprep.mubr.f32.mxu0 %v737_v0  ;;  %547 = vmatprep.mubr.f32.mxu1 %v737_v0 }
  0x44   :  { %673 = vmatmul.mubr.msk.f32.gmra.mxu0 %vm95_vm0, %v33_v21  ;;  %681 = vmatmul.mubr.msk.f32.gmra.mxu1 %vm95_vm0, %v33_v21 }
  0x45   :  { %440 = vmatprep.mubr.f32.mxu0 %v737_v0  ;;  %553 = vmatprep.mubr.f32.mxu1 %v737_v0 }
  0x48   :  { %674 = vmatmul.mubr.msk.f32.gmra.mxu0 %vm95_vm0, %v34_v22  ;;  %682 = vmatmul.mubr.msk.f32.gmra.mxu1 %vm95_vm0, %v34_v22 }
  0x49   :  { %446 = vmatprep.mubr.f32.mxu0 %v737_v0  ;;  %559 = vmatprep.mubr.f32.mxu1 %v737_v0 }
  0x4c   :  { %675 = vmatmul.mubr.msk.f32.gmra.mxu0 %vm95_vm0, %v35_v23  ;;  %683 = vmatmul.mubr.msk.f32.gmra.mxu1 %vm95_vm0, %v35_v23 }
  0x4d   :  { %452 = vmatprep.mubr.f32.mxu0 %v737_v0  ;;  %565 = vmatprep.mubr.f32.mxu1 %v737_v0 }
  0x50   :  { %676 = vmatmul.mubr.msk.f32.gmra.mxu0 %vm95_vm0, %v36_v24  ;;  %684 = vmatmul.mubr.msk.f32.gmra.mxu1 %vm95_vm0, %v36_v24  ;;  %v73_v24 = vsub.s32 4, %v853_v26 }
  0xd4   :  { %v186_v36 = vpop.f32.mrf.mxu0  ;;  %v299_v37 = vpop.f32.mrf.mxu1 }
  0xd5   :  { %v187_v38 = vadd.f32 %v186_v36, %v865_v32  ;;  %v300_v39 = vadd.f32 %v299_v37, %v868_v33  ;;  %v77_v36 = vsub.s32 5, %v853_v26  ;;  %v85_v37 = vsub.s32 7, %v853_v26 }
  0xd6   :  { %v188_v40 = vpop.f32.mrf.mxu0  ;;  %v301_v41 = vpop.f32.mrf.mxu1 }
  0xd7   :  { %572 = vst [vmem:[#allocation5] sm:$0xff] %v187_v38  ;;  %574 = vst [vmem:[#allocation5 + $0x10] sm:$0xff] %v300_v39  ;;  %v189_v42 = vadd.f32 %v188_v40, %v871_v34  ;;  %v302_v43 = vadd.f32 %v301_v41, %v874_v35 }
  0xd8   :  { %v192_v44 = vpop.f32.mrf.mxu0  ;;  %v305_v45 = vpop.f32.mrf.mxu1 }
  0xd9   :  { %573 = vst [vmem:[#allocation5 + $0x8] sm:$0xff] %v189_v42  ;;  %575 = vst [vmem:[#allocation5 + $0x18] sm:$0xff] %v302_v43  ;;  %v193_v46 = vadd.f32 %v192_v44, %v865_v32  ;;  %v306_v47 = vadd.f32 %v305_v45, %v868_v33  ;;  %v911_v42 = vrot.slane %v860_v29, %v73_v24 }
  0xda   :  { %v194_v48 = vpop.f32.mrf.mxu0  ;;  %v307_v49 = vpop.f32.mrf.mxu1  ;;  %v914_v43 = vrot.slane %v860_v29, %v81_v25 }
  0xdb   :  { %580 = vst [vmem:[#allocation5 + $0x40] sm:$0xff] %v193_v46  ;;  %582 = vst [vmem:[#allocation5 + $0x50] sm:$0xff] %v306_v47  ;;  %v195_v50 = vadd.f32 %v194_v48, %v871_v34  ;;  %v308_v51 = vadd.f32 %v307_v49, %v874_v35  ;;  %v919_v47 = vrot.slane %v860_v29, %v77_v36 }
  0xdc   :  { %v198_v52 = vpop.f32.mrf.mxu0  ;;  %v311_v53 = vpop.f32.mrf.mxu1 }
  0xdd   :  { %581 = vst [vmem:[#allocation5 + $0x48] sm:$0xff] %v195_v50  ;;  %583 = vst [vmem:[#allocation5 + $0x58] sm:$0xff] %v308_v51  ;;  %v199_v54 = vadd.f32 %v198_v52, %v865_v32  ;;  %v312_v55 = vadd.f32 %v311_v53, %v868_v33 }
  0xde   :  { %v200_v56 = vpop.f32.mrf.mxu0  ;;  %v313_v57 = vpop.f32.mrf.mxu1 }
  0xdf   :  { %588 = vst [vmem:[#allocation5 + $0x80] sm:$0xff] %v199_v54  ;;  %590 = vst [vmem:[#allocation5 + $0x90] sm:$0xff] %v312_v55  ;;  %v201_v58 = vadd.f32 %v200_v56, %v871_v34  ;;  %v314_v59 = vadd.f32 %v313_v57, %v874_v35 }
  0xe0   :  { %v204_v60 = vpop.f32.mrf.mxu0  ;;  %v317_v61 = vpop.f32.mrf.mxu1 }
  0xe1   :  { %589 = vst [vmem:[#allocation5 + $0x88] sm:$0xff] %v201_v58  ;;  %591 = vst [vmem:[#allocation5 + $0x98] sm:$0xff] %v314_v59  ;;  %v205_v62 = vadd.f32 %v204_v60, %v865_v32  ;;  %v318_v63 = vadd.f32 %v317_v61, %v868_v33 }
  0xe2   :  { %v206_v0 = vpop.f32.mrf.mxu0  ;;  %v319_v1 = vpop.f32.mrf.mxu1 }
  0xe3   :  { %596 = vst [vmem:[#allocation5 + $0xc0] sm:$0xff] %v205_v62  ;;  %598 = vst [vmem:[#allocation5 + $0xd0] sm:$0xff] %v318_v63  ;;  %v207_v2 = vadd.f32 %v206_v0, %v871_v34  ;;  %v320_v3 = vadd.f32 %v319_v1, %v874_v35 }
  0xe4   :  { %v210_v4 = vpop.f32.mrf.mxu0  ;;  %v323_v5 = vpop.f32.mrf.mxu1 }
  0xe5   :  { %597 = vst [vmem:[#allocation5 + $0xc8] sm:$0xff] %v207_v2  ;;  %599 = vst [vmem:[#allocation5 + $0xd8] sm:$0xff] %v320_v3  ;;  %v211_v6 = vadd.f32 %v210_v4, %v865_v32  ;;  %v324_v7 = vadd.f32 %v323_v5, %v868_v33 }
  0xe6   :  { %v212_v8 = vpop.f32.mrf.mxu0  ;;  %v325_v9 = vpop.f32.mrf.mxu1 }
  0xe7   :  { %604 = vst [vmem:[#allocation5 + $0x100] sm:$0xff] %v211_v6  ;;  %606 = vst [vmem:[#allocation5 + $0x110] sm:$0xff] %v324_v7  ;;  %v213_v10 = vadd.f32 %v212_v8, %v871_v34  ;;  %v326_v11 = vadd.f32 %v325_v9, %v874_v35 }
  0xe8   :  { %v216_v12 = vpop.f32.mrf.mxu0  ;;  %v329_v13 = vpop.f32.mrf.mxu1 }
  0xe9   :  { %605 = vst [vmem:[#allocation5 + $0x108] sm:$0xff] %v213_v10  ;;  %607 = vst [vmem:[#allocation5 + $0x118] sm:$0xff] %v326_v11  ;;  %v217_v14 = vadd.f32 %v216_v12, %v865_v32  ;;  %v330_v15 = vadd.f32 %v329_v13, %v868_v33 }
  0xea   :  { %v218_v16 = vpop.f32.mrf.mxu0  ;;  %v331_v17 = vpop.f32.mrf.mxu1 }
  0xeb   :  { %612 = vst [vmem:[#allocation5 + $0x140] sm:$0xff] %v217_v14  ;;  %614 = vst [vmem:[#allocation5 + $0x150] sm:$0xff] %v330_v15  ;;  %v219_v18 = vadd.f32 %v218_v16, %v871_v34  ;;  %v332_v19 = vadd.f32 %v331_v17, %v874_v35 }
  0xec   :  { %v222_v20 = vpop.f32.mrf.mxu0  ;;  %v335_v21 = vpop.f32.mrf.mxu1 }
  0xed   :  { %613 = vst [vmem:[#allocation5 + $0x148] sm:$0xff] %v219_v18  ;;  %615 = vst [vmem:[#allocation5 + $0x158] sm:$0xff] %v332_v19  ;;  %v223_v22 = vadd.f32 %v222_v20, %v865_v32  ;;  %v336_v23 = vadd.f32 %v335_v21, %v868_v33 }
  0xee   :  { %v224_v27 = vpop.f32.mrf.mxu0  ;;  %v337_v28 = vpop.f32.mrf.mxu1 }
  0xef   :  { %620 = vst [vmem:[#allocation5 + $0x180] sm:$0xff] %v223_v22  ;;  %622 = vst [vmem:[#allocation5 + $0x190] sm:$0xff] %v336_v23  ;;  %v225_v30 = vadd.f32 %v224_v27, %v871_v34  ;;  %v338_v31 = vadd.f32 %v337_v28, %v874_v35 }
  0xf0   :  { %v228_v38 = vpop.f32.mrf.mxu0  ;;  %v341_v39 = vpop.f32.mrf.mxu1 }
  0xf1   :  { %621 = vst [vmem:[#allocation5 + $0x188] sm:$0xff] %v225_v30  ;;  %623 = vst [vmem:[#allocation5 + $0x198] sm:$0xff] %v338_v31  ;;  %v229_v40 = vadd.f32 %v228_v38, %v865_v32  ;;  %v342_v41 = vadd.f32 %v341_v39, %v868_v33  ;;  %v922_v32 = vrot.slane %v860_v29, %v85_v37 }
  0xf2   :  { %v230_v44 = vpop.f32.mrf.mxu0  ;;  %v343_v45 = vpop.f32.mrf.mxu1 }
  0xf3   :  { %628 = vst [vmem:[#allocation5 + $0x1c0] sm:$0xff] %v229_v40  ;;  %630 = vst [vmem:[#allocation5 + $0x1d0] sm:$0xff] %v342_v41  ;;  %v231_v26 = vadd.f32 %v230_v44, %v871_v34  ;;  %v344_v46 = vadd.f32 %v343_v45, %v874_v35 }
  0xf4   :  { %v412_v33 = vpop.f32.mrf.mxu0  ;;  %v525_v48 = vpop.f32.mrf.mxu1 }
  0xf5   :  { %629 = vst [vmem:[#allocation5 + $0x1c8] sm:$0xff] %v231_v26  ;;  %631 = vst [vmem:[#allocation5 + $0x1d8] sm:$0xff] %v344_v46  ;;  %v413_v49 = vadd.f32 %v412_v33, %v911_v42  ;;  %v526_v50 = vadd.f32 %v525_v48, %v914_v43 }
  0xf6   :  { %v414_v51 = vpop.f32.mrf.mxu0  ;;  %v527_v52 = vpop.f32.mrf.mxu1 }
  0xf7   :  { %576 = vst [vmem:[#allocation5 + $0x20] sm:$0xff] %v413_v49  ;;  %578 = vst [vmem:[#allocation5 + $0x30] sm:$0xff] %v526_v50  ;;  %v415_v34 = vadd.f32 %v414_v51, %v919_v47  ;;  %v528_v35 = vadd.f32 %v527_v52, %v922_v32 }
  0xf8   :  { %v418_v53 = vpop.f32.mrf.mxu0  ;;  %v531_v54 = vpop.f32.mrf.mxu1 }
  0xf9   :  { %577 = vst [vmem:[#allocation5 + $0x28] sm:$0xff] %v415_v34  ;;  %579 = vst [vmem:[#allocation5 + $0x38] sm:$0xff] %v528_v35  ;;  %v419_v29 = vadd.f32 %v418_v53, %v911_v42  ;;  %v532_v55 = vadd.f32 %v531_v54, %v914_v43 }
  0xfa   :  { %v420_v56 = vpop.f32.mrf.mxu0  ;;  %v533_v57 = vpop.f32.mrf.mxu1 }
  0xfb   :  { %584 = vst [vmem:[#allocation5 + $0x60] sm:$0xff] %v419_v29  ;;  %586 = vst [vmem:[#allocation5 + $0x70] sm:$0xff] %v532_v55  ;;  %v421_v58 = vadd.f32 %v420_v56, %v919_v47  ;;  %v534_v59 = vadd.f32 %v533_v57, %v922_v32 }
  0xfc   :  { %v424_v60 = vpop.f32.mrf.mxu0  ;;  %v537_v61 = vpop.f32.mrf.mxu1 }
  0xfd   :  { %585 = vst [vmem:[#allocation5 + $0x68] sm:$0xff] %v421_v58  ;;  %587 = vst [vmem:[#allocation5 + $0x78] sm:$0xff] %v534_v59  ;;  %v425_v62 = vadd.f32 %v424_v60, %v911_v42  ;;  %v538_v63 = vadd.f32 %v537_v61, %v914_v43 }
  0xfe   :  { %v426_v0 = vpop.f32.mrf.mxu0  ;;  %v539_v1 = vpop.f32.mrf.mxu1 }
  0xff   :  { %592 = vst [vmem:[#allocation5 + $0xa0] sm:$0xff] %v425_v62  ;;  %594 = vst [vmem:[#allocation5 + $0xb0] sm:$0xff] %v538_v63  ;;  %v427_v2 = vadd.f32 %v426_v0, %v919_v47  ;;  %v540_v3 = vadd.f32 %v539_v1, %v922_v32 }
 0x100   :  { %v430_v4 = vpop.f32.mrf.mxu0  ;;  %v543_v5 = vpop.f32.mrf.mxu1 }
 0x101   :  { %593 = vst [vmem:[#allocation5 + $0xa8] sm:$0xff] %v427_v2  ;;  %595 = vst [vmem:[#allocation5 + $0xb8] sm:$0xff] %v540_v3  ;;  %v431_v6 = vadd.f32 %v430_v4, %v911_v42  ;;  %v544_v7 = vadd.f32 %v543_v5, %v914_v43 }
 0x102   :  { %v432_v8 = vpop.f32.mrf.mxu0  ;;  %v545_v9 = vpop.f32.mrf.mxu1 }
 0x103   :  { %600 = vst [vmem:[#allocation5 + $0xe0] sm:$0xff] %v431_v6  ;;  %602 = vst [vmem:[#allocation5 + $0xf0] sm:$0xff] %v544_v7  ;;  %v433_v10 = vadd.f32 %v432_v8, %v919_v47  ;;  %v546_v11 = vadd.f32 %v545_v9, %v922_v32 }
 0x104   :  { %v436_v12 = vpop.f32.mrf.mxu0  ;;  %v549_v13 = vpop.f32.mrf.mxu1 }
 0x105   :  { %601 = vst [vmem:[#allocation5 + $0xe8] sm:$0xff] %v433_v10  ;;  %603 = vst [vmem:[#allocation5 + $0xf8] sm:$0xff] %v546_v11  ;;  %v437_v14 = vadd.f32 %v436_v12, %v911_v42  ;;  %v550_v15 = vadd.f32 %v549_v13, %v914_v43 }
 0x106   :  { %v438_v16 = vpop.f32.mrf.mxu0  ;;  %v551_v17 = vpop.f32.mrf.mxu1 }
 0x107   :  { %608 = vst [vmem:[#allocation5 + $0x120] sm:$0xff] %v437_v14  ;;  %610 = vst [vmem:[#allocation5 + $0x130] sm:$0xff] %v550_v15  ;;  %v439_v18 = vadd.f32 %v438_v16, %v919_v47  ;;  %v552_v19 = vadd.f32 %v551_v17, %v922_v32 }
 0x108   :  { %v442_v20 = vpop.f32.mrf.mxu0  ;;  %v555_v21 = vpop.f32.mrf.mxu1 }
 0x109   :  { %609 = vst [vmem:[#allocation5 + $0x128] sm:$0xff] %v439_v18  ;;  %611 = vst [vmem:[#allocation5 + $0x138] sm:$0xff] %v552_v19  ;;  %v443_v22 = vadd.f32 %v442_v20, %v911_v42  ;;  %v556_v23 = vadd.f32 %v555_v21, %v914_v43 }
 0x10a   :  { %v444_v24 = vpop.f32.mrf.mxu0  ;;  %v557_v25 = vpop.f32.mrf.mxu1 }
 0x10b   :  { %616 = vst [vmem:[#allocation5 + $0x160] sm:$0xff] %v443_v22  ;;  %618 = vst [vmem:[#allocation5 + $0x170] sm:$0xff] %v556_v23  ;;  %v445_v27 = vadd.f32 %v444_v24, %v919_v47  ;;  %v558_v28 = vadd.f32 %v557_v25, %v922_v32 }
 0x10c   :  { %v448_v30 = vpop.f32.mrf.mxu0  ;;  %v561_v31 = vpop.f32.mrf.mxu1 }
 0x10d   :  { %617 = vst [vmem:[#allocation5 + $0x168] sm:$0xff] %v445_v27  ;;  %619 = vst [vmem:[#allocation5 + $0x178] sm:$0xff] %v558_v28  ;;  %v449_v36 = vadd.f32 %v448_v30, %v911_v42  ;;  %v562_v37 = vadd.f32 %v561_v31, %v914_v43 }
 0x10e   :  { %v450_v38 = vpop.f32.mrf.mxu0  ;;  %v563_v39 = vpop.f32.mrf.mxu1 }
 0x10f   :  { %624 = vst [vmem:[#allocation5 + $0x1a0] sm:$0xff] %v449_v36  ;;  %626 = vst [vmem:[#allocation5 + $0x1b0] sm:$0xff] %v562_v37  ;;  %v451_v40 = vadd.f32 %v450_v38, %v919_v47  ;;  %v564_v41 = vadd.f32 %v563_v39, %v922_v32 }
 0x110   :  { %v454_v44 = vpop.f32.mrf.mxu0  ;;  %v567_v45 = vpop.f32.mrf.mxu1 }
 0x111   :  { %625 = vst [vmem:[#allocation5 + $0x1a8] sm:$0xff] %v451_v40  ;;  %627 = vst [vmem:[#allocation5 + $0x1b8] sm:$0xff] %v564_v41  ;;  %v455_v26 = vadd.f32 %v454_v44, %v911_v42  ;;  %v568_v46 = vadd.f32 %v567_v45, %v914_v43 }
 0x112   :  { %v456_v33 = vpop.f32.mrf.mxu0  ;;  %v569_v48 = vpop.f32.mrf.mxu1 }
 0x113   :  { %632 = vst [vmem:[#allocation5 + $0x1e0] sm:$0xff] %v455_v26  ;;  %634 = vst [vmem:[#allocation5 + $0x1f0] sm:$0xff] %v568_v46  ;;  %v457_v49 = vadd.f32 %v456_v33, %v919_v47  ;;  %v570_v50 = vadd.f32 %v569_v48, %v922_v32 }
 0x115   :  { %633 = vst [vmem:[#allocation5 + $0x1e8] sm:$0xff] %v457_v49  ;;  %635 = vst [vmem:[#allocation5 + $0x1f8] sm:$0xff] %v570_v50 }
 0x116   :  { %721 = shalt.err (!%p718_p9)
}
 0x117   :  { %647 = dma.vmem_to_hbm [thread:$0]  %s642_s8, 8192, %s965_s3, [#allocation4], %s735_s15, %s735_s15, %s736_s16  }
 0x118   :  { %732 = dma.done.wait [#allocation4], 8192  }
 0x119   :  { %733 = vsyncadd [#allocation4], 4294959104 }
 0x11a   :  { %651 = vsyncpa [#allocation3], 1 }
 0x11b   :  { %652 = vsyncpa [#allocation4], 1 }

</bundles_post_ra>
